<compile_context>
chip_gen: v5e
topology: v5e:2x2
jax: 0.10.0
libtpu: 0.0.40
codegen_flags: <defaults>
</compile_context>

<pallas_src>
import functools

import jax
import jax.numpy as jnp
from jax.experimental import pallas as pl
from jax.experimental.pallas import tpu as pltpu


def _round_up(v, m):
    return (v + m - 1) // m * m


# ----------------------------------------------------------------------------
# Kernel
# ----------------------------------------------------------------------------
def edgeconv_kernel(x_ref, w_ref, b_ref, o_ref, *, chunk):
    # x_ref: (1, K, Cin, TN)  compute dtype; per-k slices are MXU-ready (Cin, TN)
    # w_ref: (Cout, Cin)      compute dtype; BN-folded 1x1 conv weight
    # b_ref: (Cout, 1)  f32   BN-folded bias
    # o_ref: (1, Cout, TN)    lane-dense output tile
    _, K, _, TN = x_ref.shape
    w = w_ref[...]
    b = b_ref[...]

    # Process TN in `chunk`-lane sub-tiles so the live f32 running max (plus
    # one transient) stays within the vreg file -> no spills.
    for c in range(TN // chunk):
        sl = pl.ds(c * chunk, chunk)
        # Running max over neighbors: MXU matmul per k, VPU maximum, f32 acc.
        acc = jnp.dot(w, x_ref[0, 0, :, sl], preferred_element_type=jnp.float32)
        for k in range(1, K):
            y = jnp.dot(w, x_ref[0, k, :, sl], preferred_element_type=jnp.float32)
            acc = jnp.maximum(acc, y)
        # Bias + ReLU once (valid: bias constant over K, ReLU monotonic).
        o_ref[0, :, sl] = jnp.maximum(acc + b, 0.0).astype(o_ref.dtype)


# ----------------------------------------------------------------------------
# Tiling / VMEM heuristics
# ----------------------------------------------------------------------------
def _vmem_need_bytes(tn, K, Cin, Cout, in_bytes, out_bytes):
    tnp = _round_up(tn, 128)
    x_blk = K * _round_up(Cin, 16) * tnp * in_bytes          # double-buffered
    o_blk = _round_up(Cout, 16) * tnp * out_bytes            # double-buffered
    w_blk = _round_up(Cout, 16) * _round_up(Cin, 128) * in_bytes  # resident once
    b_blk = _round_up(Cout, 8) * 128 * 4                          # resident once
    # 25% headroom for Mosaic-internal scratch + 2 MiB slack.
    return int(1.25 * (2 * (x_blk + o_blk) + w_blk + b_blk)) + (2 << 20)


def _vmem_budget_bytes():
    try:
        cap = int(pltpu.get_tpu_info().vmem_capacity_bytes)
    except Exception:
        cap = 64 << 20  # conservative default (v7x physical VMEM)
    return min(cap // 2, 56 << 20)


def _pick_tile_n(N, B, need_fn, budget):
    # Lane-dense candidates; never emit a block wider than the N axis.
    if N <= 512:
        cands = [N] + [t for t in (256, 128) if t < N]
    else:
        cands = [t for t in (1024, 512, 256, 128) if t <= N]
    fits = [t for t in cands if need_fn(t) <= budget] or [cands[-1]]
    # Prefer the largest tile that still exposes >= 8 grid steps (keeps both
    # v7x TensorCores and the DMA pipeline busy); otherwise take the largest.
    for t in fits:
        if B * pl.cdiv(N, t) >= 8:
            return t
    return fits[0]


# ----------------------------------------------------------------------------
# Wrappers
# ----------------------------------------------------------------------------
def _fold_batchnorm(conv_w, bn_gamma, bn_beta, bn_mean, bn_var, eps, compute_dtype):
    scale = bn_gamma / jnp.sqrt(bn_var + eps)                                 # (Cout,)
    w_eff = (conv_w[:, :, 0, 0] * scale[:, None]).astype(compute_dtype)       # (Cout, Cin)
    b_eff = (bn_beta - bn_mean * scale).reshape(-1, 1).astype(jnp.float32)    # (Cout, 1)
    return w_eff, b_eff


def edge_conv_core(x_bkcn, w_eff, b_eff, *, out_dtype=jnp.bfloat16):
    """EdgeConv core kernel.

    x_bkcn: (B, K, Cin, N) edge features in the compute dtype -- the layout
            the upstream KNN-gather/concat should emit directly.
    w_eff:  (Cout, Cin) BN-folded weight (compute dtype).
    b_eff:  (Cout, 1)   BN-folded bias (f32).
    Returns (B, Cout, N) in out_dtype.
    """
    B, K, Cin, N = x_bkcn.shape
    Cout = w_eff.shape[0]
    in_bytes = jnp.dtype(x_bkcn.dtype).itemsize
    out_bytes = jnp.dtype(out_dtype).itemsize

    need = functools.partial(_vmem_need_bytes, K=K, Cin=Cin, Cout=Cout,
                             in_bytes=in_bytes, out_bytes=out_bytes)
    budget = _vmem_budget_bytes()
    TN = _pick_tile_n(N, B, need, budget)

    # Accumulator chunk: keep (Cout, chunk) f32 (+ one transient) small.
    if TN % 256 == 0 and Cout <= 64:
        chunk = 256
    elif TN % 128 == 0:
        chunk = 128
    else:
        chunk = TN

    grid = (B, pl.cdiv(N, TN))

    limit = need(TN)
    vmem_limit = None if limit <= (30 << 20) else min(limit, 56 << 20)

    cost = pl.CostEstimate(
        flops=2 * B * N * K * Cin * Cout,
        transcendentals=0,
        bytes_accessed=(B * K * Cin * N * in_bytes) + (Cout * Cin * in_bytes)
        + (Cout * 4) + (B * Cout * N * out_bytes),
    )

    kernel = functools.partial(edgeconv_kernel, chunk=chunk)

    return pl.pallas_call(
        kernel,
        out_shape=jax.ShapeDtypeStruct((B, Cout, N), out_dtype),
        grid_spec=pltpu.PrefetchScalarGridSpec(
            num_scalar_prefetch=0,
            grid=grid,
            in_specs=[
                pl.BlockSpec((1, K, Cin, TN), lambda b, n: (b, 0, 0, n)),
                pl.BlockSpec((Cout, Cin), lambda b, n: (0, 0)),
                pl.BlockSpec((Cout, 1), lambda b, n: (0, 0)),
            ],
            out_specs=pl.BlockSpec((1, Cout, TN), lambda b, n: (b, 0, n)),
        ),
        compiler_params=pltpu.CompilerParams(
            dimension_semantics=("parallel", "parallel"),
            vmem_limit_bytes=vmem_limit,
        ),
        cost_estimate=cost,
    )(x_bkcn, w_eff, b_eff)


def edge_conv_block(x_nchw, conv_w, bn_gamma, bn_beta, bn_mean, bn_var,
                    eps=1e-5, *, compute_dtype=jnp.bfloat16,
                    out_dtype=jnp.bfloat16):
    """Drop-in equivalent of PyTorch EdgeConvBlock.forward (eval mode), NCHW in.

    NOTE: the relayout below is an extra HBM pass over x.
    TODO(synk): fuse this transpose+cast into the upstream KNN-gather/concat
    producer (emit (B, K, Cin, N) in compute_dtype) and call edge_conv_core
    directly -- worth ~2-3x end-to-end for this memory-bound op.  For the very
    first layer (tiny Cin, raw coordinates) pass compute_dtype=jnp.float32.
    """
    w_eff, b_eff = _fold_batchnorm(conv_w, bn_gamma, bn_beta, bn_mean, bn_var,
                                   eps, compute_dtype)
    x = jnp.transpose(x_nchw, (0, 3, 1, 2)).astype(compute_dtype)  # (B, K, Cin, N)
    return edge_conv_core(x, w_eff, b_eff, out_dtype=out_dtype)


# ----------------------------------------------------------------------------
# Reference + test harness
# ----------------------------------------------------------------------------
def _reference(x_nchw, conv_w, bn_gamma, bn_beta, bn_mean, bn_var, eps=1e-5):
    y = jnp.einsum('bcnk,oc->bonk', x_nchw, conv_w[:, :, 0, 0])
    scale = bn_gamma / jnp.sqrt(bn_var + eps)
    y = y * scale[None, :, None, None] + (bn_beta - bn_mean * scale)[None, :, None, None]
    y = jnp.maximum(y, 0.0)
    return jnp.max(y, axis=-1)


if __name__ == "__main__":
    key = jax.random.PRNGKey(0)
    B, Cin, N, K = 2, 4, 16, 8     # batch, in-channels, points, neighbors
    Cout = 32

    k1, k2, k3, k4, k5, k6 = jax.random.split(key, 6)
    x = jax.random.normal(k1, (B, Cin, N, K), dtype=jnp.float32)
    conv_w = jax.random.normal(k2, (Cout, Cin, 1, 1), dtype=jnp.float32) * 0.1
    bn_gamma = jax.random.uniform(k3, (Cout,), dtype=jnp.float32, minval=0.5, maxval=1.5)
    bn_beta = jax.random.normal(k4, (Cout,), dtype=jnp.float32) * 0.1
    bn_mean = jax.random.normal(k5, (Cout,), dtype=jnp.float32) * 0.1
    bn_var = jax.random.uniform(k6, (Cout,), dtype=jnp.float32, minval=0.5, maxval=1.5)

    out = edge_conv_block(x, conv_w, bn_gamma, bn_beta, bn_mean, bn_var)
    out = jax.block_until_ready(out)

    ref = _reference(x, conv_w, bn_gamma, bn_beta, bn_mean, bn_var)
    assert out.shape == (B, Cout, N), out.shape
    assert out.dtype == jnp.bfloat16, out.dtype
    # bf16 inputs / weights / output (f32 accumulation) -> loose tolerance.
    assert jnp.allclose(out.astype(jnp.float32), ref, atol=3e-2, rtol=3e-2), \
        "mismatch vs reference"
    print("KERNEL_OK")
</pallas_src>

<mosaic_0001>
module attributes {stable_mosaic.version = 11 : i64} {
  func.func @edgeconv_kernel(%arg0: i32, %arg1: i32, %arg2: memref<1x8x4x16xbf16, #tpu.memory_space<vmem>>, %arg3: memref<32x4xbf16, #tpu.memory_space<vmem>>, %arg4: memref<32x1xf32, #tpu.memory_space<vmem>>, %arg5: memref<1x32x16xbf16, #tpu.memory_space<vmem>>) attributes {dimension_semantics = [#tpu.dimension_semantics<parallel>, #tpu.dimension_semantics<parallel>], iteration_bounds = array<i64: 2, 1>, scalar_prefetch = 0 : i64, scratch_operands = 0 : i64, tpu.core_type = #tpu.core_type<tc>, window_params = [{transform_indices = @transform_0, window_bounds = array<i64: 1, 8, 4, 16>}, {pipeline_mode = #tpu.pipeline_mode<synchronous>, transform_indices = @transform_1, window_bounds = array<i64: 32, 4>}, {pipeline_mode = #tpu.pipeline_mode<synchronous>, transform_indices = @transform_2, window_bounds = array<i64: 32, 1>}, {transform_indices = @transform_3, window_bounds = array<i64: 1, 32, 16>}]} {
    %c0 = arith.constant 0 : index
    %c0_0 = arith.constant 0 : index
    %0 = vector.load %arg3[%c0, %c0_0] : memref<32x4xbf16, #tpu.memory_space<vmem>>, vector<32x4xbf16>
    %c0_1 = arith.constant 0 : index
    %c0_2 = arith.constant 0 : index
    %1 = vector.load %arg4[%c0_1, %c0_2] : memref<32x1xf32, #tpu.memory_space<vmem>>, vector<32x1xf32>
    %c0_3 = arith.constant 0 : index
    %c0_4 = arith.constant 0 : index
    %c0_5 = arith.constant 0 : index
    %c0_6 = arith.constant 0 : index
    %2 = vector.load %arg2[%c0_3, %c0_4, %c0_5, %c0_6] : memref<1x8x4x16xbf16, #tpu.memory_space<vmem>>, vector<1x1x4x16xbf16>
    %3 = vector.shape_cast %2 : vector<1x1x4x16xbf16> to vector<4x16xbf16>
    %cst = arith.constant dense<0.000000e+00> : vector<32x16xf32>
    %4 = tpu.matmul %0, %3, %cst {dimension_numbers = #tpu.dot_dimension_numbers<[1], [0], [0], [1], [0, 0, 1, 1], [], []>} : vector<32x4xbf16>, vector<4x16xbf16>, vector<32x16xf32> -> vector<32x16xf32>
    %c0_7 = arith.constant 0 : index
    %c1 = arith.constant 1 : index
    %c0_8 = arith.constant 0 : index
    %c0_9 = arith.constant 0 : index
    %5 = vector.load %arg2[%c0_7, %c1, %c0_8, %c0_9] : memref<1x8x4x16xbf16, #tpu.memory_space<vmem>>, vector<1x1x4x16xbf16>
    %6 = vector.shape_cast %5 : vector<1x1x4x16xbf16> to vector<4x16xbf16>
    %cst_10 = arith.constant dense<0.000000e+00> : vector<32x16xf32>
    %7 = tpu.matmul %0, %6, %cst_10 {dimension_numbers = #tpu.dot_dimension_numbers<[1], [0], [0], [1], [0, 0, 1, 1], [], []>} : vector<32x4xbf16>, vector<4x16xbf16>, vector<32x16xf32> -> vector<32x16xf32>
    %8 = arith.maximumf %4, %7 : vector<32x16xf32>
    %c0_11 = arith.constant 0 : index
    %c2 = arith.constant 2 : index
    %c0_12 = arith.constant 0 : index
    %c0_13 = arith.constant 0 : index
    %9 = vector.load %arg2[%c0_11, %c2, %c0_12, %c0_13] : memref<1x8x4x16xbf16, #tpu.memory_space<vmem>>, vector<1x1x4x16xbf16>
    %10 = vector.shape_cast %9 : vector<1x1x4x16xbf16> to vector<4x16xbf16>
    %cst_14 = arith.constant dense<0.000000e+00> : vector<32x16xf32>
    %11 = tpu.matmul %0, %10, %cst_14 {dimension_numbers = #tpu.dot_dimension_numbers<[1], [0], [0], [1], [0, 0, 1, 1], [], []>} : vector<32x4xbf16>, vector<4x16xbf16>, vector<32x16xf32> -> vector<32x16xf32>
    %12 = arith.maximumf %8, %11 : vector<32x16xf32>
    %c0_15 = arith.constant 0 : index
    %c3 = arith.constant 3 : index
    %c0_16 = arith.constant 0 : index
    %c0_17 = arith.constant 0 : index
    %13 = vector.load %arg2[%c0_15, %c3, %c0_16, %c0_17] : memref<1x8x4x16xbf16, #tpu.memory_space<vmem>>, vector<1x1x4x16xbf16>
    %14 = vector.shape_cast %13 : vector<1x1x4x16xbf16> to vector<4x16xbf16>
    %cst_18 = arith.constant dense<0.000000e+00> : vector<32x16xf32>
    %15 = tpu.matmul %0, %14, %cst_18 {dimension_numbers = #tpu.dot_dimension_numbers<[1], [0], [0], [1], [0, 0, 1, 1], [], []>} : vector<32x4xbf16>, vector<4x16xbf16>, vector<32x16xf32> -> vector<32x16xf32>
    %16 = arith.maximumf %12, %15 : vector<32x16xf32>
    %c0_19 = arith.constant 0 : index
    %c4 = arith.constant 4 : index
    %c0_20 = arith.constant 0 : index
    %c0_21 = arith.constant 0 : index
    %17 = vector.load %arg2[%c0_19, %c4, %c0_20, %c0_21] : memref<1x8x4x16xbf16, #tpu.memory_space<vmem>>, vector<1x1x4x16xbf16>
    %18 = vector.shape_cast %17 : vector<1x1x4x16xbf16> to vector<4x16xbf16>
    %cst_22 = arith.constant dense<0.000000e+00> : vector<32x16xf32>
    %19 = tpu.matmul %0, %18, %cst_22 {dimension_numbers = #tpu.dot_dimension_numbers<[1], [0], [0], [1], [0, 0, 1, 1], [], []>} : vector<32x4xbf16>, vector<4x16xbf16>, vector<32x16xf32> -> vector<32x16xf32>
    %20 = arith.maximumf %16, %19 : vector<32x16xf32>
    %c0_23 = arith.constant 0 : index
    %c5 = arith.constant 5 : index
    %c0_24 = arith.constant 0 : index
    %c0_25 = arith.constant 0 : index
    %21 = vector.load %arg2[%c0_23, %c5, %c0_24, %c0_25] : memref<1x8x4x16xbf16, #tpu.memory_space<vmem>>, vector<1x1x4x16xbf16>
    %22 = vector.shape_cast %21 : vector<1x1x4x16xbf16> to vector<4x16xbf16>
    %cst_26 = arith.constant dense<0.000000e+00> : vector<32x16xf32>
    %23 = tpu.matmul %0, %22, %cst_26 {dimension_numbers = #tpu.dot_dimension_numbers<[1], [0], [0], [1], [0, 0, 1, 1], [], []>} : vector<32x4xbf16>, vector<4x16xbf16>, vector<32x16xf32> -> vector<32x16xf32>
    %24 = arith.maximumf %20, %23 : vector<32x16xf32>
    %c0_27 = arith.constant 0 : index
    %c6 = arith.constant 6 : index
    %c0_28 = arith.constant 0 : index
    %c0_29 = arith.constant 0 : index
    %25 = vector.load %arg2[%c0_27, %c6, %c0_28, %c0_29] : memref<1x8x4x16xbf16, #tpu.memory_space<vmem>>, vector<1x1x4x16xbf16>
    %26 = vector.shape_cast %25 : vector<1x1x4x16xbf16> to vector<4x16xbf16>
    %cst_30 = arith.constant dense<0.000000e+00> : vector<32x16xf32>
    %27 = tpu.matmul %0, %26, %cst_30 {dimension_numbers = #tpu.dot_dimension_numbers<[1], [0], [0], [1], [0, 0, 1, 1], [], []>} : vector<32x4xbf16>, vector<4x16xbf16>, vector<32x16xf32> -> vector<32x16xf32>
    %28 = arith.maximumf %24, %27 : vector<32x16xf32>
    %c0_31 = arith.constant 0 : index
    %c7 = arith.constant 7 : index
    %c0_32 = arith.constant 0 : index
    %c0_33 = arith.constant 0 : index
    %29 = vector.load %arg2[%c0_31, %c7, %c0_32, %c0_33] : memref<1x8x4x16xbf16, #tpu.memory_space<vmem>>, vector<1x1x4x16xbf16>
    %30 = vector.shape_cast %29 : vector<1x1x4x16xbf16> to vector<4x16xbf16>
    %cst_34 = arith.constant dense<0.000000e+00> : vector<32x16xf32>
    %31 = tpu.matmul %0, %30, %cst_34 {dimension_numbers = #tpu.dot_dimension_numbers<[1], [0], [0], [1], [0, 0, 1, 1], [], []>} : vector<32x4xbf16>, vector<4x16xbf16>, vector<32x16xf32> -> vector<32x16xf32>
    %32 = arith.maximumf %28, %31 : vector<32x16xf32>
    %33 = vector.broadcast %1 : vector<32x1xf32> to vector<32x16xf32>
    %34 = arith.addf %32, %33 : vector<32x16xf32>
    %cst_35 = arith.constant 0.000000e+00 : f32
    %35 = vector.broadcast %cst_35 : f32 to vector<32x16xf32>
    %36 = arith.maximumf %34, %35 : vector<32x16xf32>
    %37 = arith.truncf %36 : vector<32x16xf32> to vector<32x16xbf16>
    %c0_36 = arith.constant 0 : index
    %c0_37 = arith.constant 0 : index
    %c0_38 = arith.constant 0 : index
    %38 = vector.load %arg5[%c0_36, %c0_37, %c0_38] : memref<1x32x16xbf16, #tpu.memory_space<vmem>>, vector<1x32x16xbf16>
    %39 = vector.shape_cast %38 : vector<1x32x16xbf16> to vector<32x16xbf16>
    %40 = vector.shape_cast %37 : vector<32x16xbf16> to vector<1x32x16xbf16>
    tpu.vector_store %arg5[%c0_36, %c0_37, %c0_38], %40 {strides = array<i32>} : memref<1x32x16xbf16, #tpu.memory_space<vmem>>, vector<1x32x16xbf16>,
    return
  }
  func.func @transform_0(%arg0: i32, %arg1: i32) -> (i32, i32, i32, i32) {
    %c0_i32 = arith.constant 0 : i32
    %c0_i32_0 = arith.constant 0 : i32
    %c0_i32_1 = arith.constant 0 : i32
    return %arg0, %c0_i32, %c0_i32_0, %arg1 : i32, i32, i32, i32
  }
  func.func @transform_1(%arg0: i32, %arg1: i32) -> (i32, i32) {
    %c0_i32 = arith.constant 0 : i32
    %c0_i32_0 = arith.constant 0 : i32
    %c0_i32_1 = arith.constant 0 : i32
    return %c0_i32, %c0_i32_0 : i32, i32
  }
  func.func @transform_2(%arg0: i32, %arg1: i32) -> (i32, i32) {
    %c0_i32 = arith.constant 0 : i32
    %c0_i32_0 = arith.constant 0 : i32
    %c0_i32_1 = arith.constant 0 : i32
    return %c0_i32, %c0_i32_0 : i32, i32
  }
  func.func @transform_3(%arg0: i32, %arg1: i32) -> (i32, i32, i32) {
    %c0_i32 = arith.constant 0 : i32
    %c0_i32_0 = arith.constant 0 : i32
    return %arg0, %c0_i32, %arg1 : i32, i32, i32
  }
}

</mosaic_0001>

<bundles_post_ra>
// kernel: tpu_custom_call.1
= control target key start
LH: loop header
LB: loop body
LE: loop exit
PB: predicated region body
PF: predicated region fallthrough
CT: control target
= control target key end

     0   :  { %s686_s12 = smov 0   ;;  %s688_s13 = smov 0   ;;  %s778_s0 = inlined_call_operand.vmem [shape: bf16[2,8,4,16], index: 0, kind: input, shape index: {}]   ;;  %s779_s1 = inlined_call_operand.vmem [shape: bf16[32,4], index: 1, kind: input, shape index: {}]   ;;  %s780_s2 = inlined_call_operand.vmem [shape: f32[32,1], index: 2, kind: input, shape index: {}]   ;;  %s781_s3 = inlined_call_operand.vmem [shape: bf16[2,32,16], index: 3, kind: output, shape index: {}]  }
   0x1   :  { %s690_s14 = smov 0  }
   0x2 LB: > { %s25_s15 = sadd.s32 1, %s659_s13  ;;  %p572_p0 = scmp.ge.s32.totalorder %s663_s14, 1  ;;  %s663_s14 = sphi %s690_s14, %s13_s14   ;;  %s659_s13 = sphi %s688_s13, %s783_s13   ;;  %s655_s12 = sphi %s686_s12, %s782_s12  }
   0x3   : > { %p27_p1 = scmp.ge.s32.totalorder %s25_s15, 2  ;;  %p156_p2 = scmp.lt.s32.totalorder %s663_s14, 3 }
   0x5   : > { %s785_s15 = smov (%p27_p1, %s25_s15), 0  ;;  %p157_p3 = pnand %p572_p0, %p156_p2 }
   0x6   : > { %p186_p4 = scmp.lt.s32.totalorder (!%p157_p3), %s655_s12, 1 }
   0x7   : > { %160 = sbr.rel (%p157_p3) target bundleno = 220 (0xdc), region = 32 }
   0xc   : > { %s787_s12 = smov (!%p186_p4, %s655_s12), 1  ;;  %vm229_vm0 = vcmask 1041408   ;;  %v612_v7 = vld [vmem:[%s779_s1] sm:$0xff]  ;;  %vm222_vm1 = vcmask 31744   ;;  %v613_v17 = vld [vmem:[%s779_s1 + $0x8] sm:$0xff]  ;;  %v209_v19 = vld [vmem:[%s780_s2 + $0x10] sm:$0xff] }
   0xd   : > { %s610_s16 = sshll.u32 %s787_s12, 4  ;;  %v207_v18 = vld [vmem:[%s780_s2] sm:$0xff]  ;;  %v665_v20 = vmov 0   ;;  %v208_v21 = vld [vmem:[%s780_s2 + $0x8] sm:$0xff]  ;;  %v210_v22 = vld [vmem:[%s780_s2 + $0x18] sm:$0xff]  ;;  %vm480_vm2 = vcmask 125952  }
   0xe   : > { %s193_s19 = scalar_lea.vmem %s778_s0, %s610_s16  ;;  %639 = vset.pattern.permute.xlu0 %v665_v20  ;;  %640 = vset.pattern.permute.xlu1 %v665_v20  ;;  %s759_s7 = scalar_lea.vmem %s781_s3, %s610_s16 }
   0xf   : > { %v211_v0 = vld [vmem:[%s193_s19] sm:$0x3]  ;;  %v587_v1 = vld [vmem:[%s193_s19 + $0x2] sm:$0x3]  ;;  %v590_v2 = vld [vmem:[%s193_s19 + $0x4] sm:$0x3]  ;;  %450 = vperm.xlu0 %639, %v207_v18   ;;  %460 = vperm.xlu1 %640, %v209_v19  }
  0x10   : > { %v231_v3 = vsel %vm229_vm0, %v211_v0, 0  ;;  %v255_v4 = vsel %vm229_vm0, %v587_v1, 0  ;;  %v283_v5 = vsel %vm229_vm0, %v590_v2, 0  ;;  %v593_v6 = vld [vmem:[%s193_s19 + $0x6] sm:$0x3] }
  0x11   : > { %240 = vmatpush.bf16.msra.mxu0 %v231_v3  ;;  %264 = vmatpush.bf16.msra.mxu1 %v255_v4  ;;  %v311_v8 = vsel %vm229_vm0, %v593_v6, 0  ;;  %v602_v9 = vld [vmem:[%s193_s19 + $0xc] sm:$0x3]  ;;  %v596_v10 = vld [vmem:[%s193_s19 + $0x8] sm:$0x3] }
  0x12   : > { %292 = vmatpush.bf16.msra.mxu2 %v283_v5  ;;  %320 = vmatpush.bf16.msra.mxu3 %v311_v8  ;;  %v395_v11 = vsel %vm229_vm0, %v602_v9, 0  ;;  %v339_v12 = vsel %vm229_vm0, %v596_v10, 0  ;;  %v605_v13 = vld [vmem:[%s193_s19 + $0xe] sm:$0x3]  ;;  %v599_v14 = vld [vmem:[%s193_s19 + $0xa] sm:$0x3] }
  0x13   : > { %v423_v15 = vsel %vm229_vm0, %v605_v13, 0  ;;  %v367_v16 = vsel %vm229_vm0, %v599_v14, 0 }
  0x14   : > { %585 = vmatmul.msk.bf16.vlgmr.msra.gmra.mxu0 %vm222_vm1, %v612_v7  ;;  %588 = vmatmul.msk.bf16.vlgmr.msra.gmra.mxu1 %vm222_vm1, %v612_v7 }
  0x15   : > { %348 = vmatpush.bf16.msrb.mxu0 %v339_v12  ;;  %591 = vmatmul.msk.bf16.vlgmr.msra.gmra.mxu2 %vm222_vm1, %v612_v7 }
  0x16   : > { %404 = vmatpush.bf16.msrb.mxu2 %v395_v11  ;;  %594 = vmatmul.msk.bf16.vlgmr.msra.gmra.mxu3 %vm222_vm1, %v612_v7 }
  0x17   : > { %432 = vmatpush.bf16.msrb.mxu3 %v423_v15  ;;  %376 = vmatpush.bf16.msrb.mxu1 %v367_v16 }
  0x18   : > { %455 = vperm.xlu0 %639, %v208_v21   ;;  %465 = vperm.xlu1 %640, %v210_v22  }
  0x24   : > { %586 = vmatmul.msk.bf16.gmra.mxu0 %vm222_vm1, %v613_v17  ;;  %589 = vmatmul.msk.bf16.gmra.mxu1 %vm222_vm1, %v613_v17 }
  0x25   : > { %592 = vmatmul.msk.bf16.gmra.mxu2 %vm222_vm1, %v613_v17 }
  0x26   : > { %595 = vmatmul.msk.bf16.gmra.mxu3 %vm222_vm1, %v613_v17 }
  0x34   : > { %597 = vmatmul.msk.bf16.vlgmr.msrb.gmra.mxu0 %vm222_vm1, %v612_v7  ;;  %600 = vmatmul.msk.bf16.vlgmr.msrb.gmra.mxu1 %vm222_vm1, %v612_v7 }
  0x35   : > { %603 = vmatmul.msk.bf16.vlgmr.msrb.gmra.mxu2 %vm222_vm1, %v612_v7 }
  0x36   : > { %606 = vmatmul.msk.bf16.vlgmr.msrb.gmra.mxu3 %vm222_vm1, %v612_v7 }
  0x44   : > { %598 = vmatmul.msk.bf16.gmra.mxu0 %vm222_vm1, %v613_v17  ;;  %601 = vmatmul.msk.bf16.gmra.mxu1 %vm222_vm1, %v613_v17 }
  0x45   : > { %604 = vmatmul.msk.bf16.gmra.mxu2 %vm222_vm1, %v613_v17 }
  0x46   : > { %607 = vmatmul.msk.bf16.gmra.mxu3 %vm222_vm1, %v613_v17 }
  0x81   : > { %v451_v48 = vpop.permute.xlu0 %450  ;;  %v461_v19 = vpop.permute.xlu1 %460 }
  0x8a   : > { %v456_v4 = vpop.permute.xlu0 %455 }
  0x91   : > { %v242_v23 = vpop.f32.mrf.mxu0  ;;  %v266_v24 = vpop.f32.mrf.mxu1 }
  0x92   : > { %v276_v37 = vmax.f32 %v242_v23, %v266_v24 }
  0x98   : > { %v294_v25 = vpop.f32.mrf.mxu2 }
  0x99   : > { %v322_v26 = vpop.f32.mrf.mxu3  ;;  %v244_v27 = vpop.f32.mrf.mxu0  ;;  %v304_v38 = vmax.f32 %v276_v37, %v294_v25 }
  0x9a   : > { %v268_v28 = vpop.f32.mrf.mxu1 }
  0x9b   : > { %v332_v41 = vmax.f32 %v304_v38, %v322_v26  ;;  %v277_v44 = vmax.f32 %v244_v27, %v268_v28 }
  0xa0   : > { %v296_v29 = vpop.f32.mrf.mxu2 }
  0xa1   : > { %v324_v30 = vpop.f32.mrf.mxu3  ;;  %v247_v31 = vpop.f32.mrf.mxu0  ;;  %v305_v46 = vmax.f32 %v277_v44, %v296_v29 }
  0xa2   : > { %v271_v32 = vpop.f32.mrf.mxu1 }
  0xa3   : > { %v333_v51 = vmax.f32 %v305_v46, %v324_v30  ;;  %v278_v55 = vmax.f32 %v247_v31, %v271_v32  ;;  %v466_v31 = vpop.permute.xlu1 %465 }
  0xa8   : > { %v299_v33 = vpop.f32.mrf.mxu2 }
  0xa9   : > { %v327_v34 = vpop.f32.mrf.mxu3  ;;  %v249_v35 = vpop.f32.mrf.mxu0  ;;  %v306_v58 = vmax.f32 %v278_v55, %v299_v33 }
  0xaa   : > { %v273_v36 = vpop.f32.mrf.mxu1 }
  0xab   : > { %v334_v0 = vmax.f32 %v306_v58, %v327_v34  ;;  %v279_v5 = vmax.f32 %v249_v35, %v273_v36 }
  0xb0   : > { %v301_v39 = vpop.f32.mrf.mxu2 }
  0xb1   : > { %v329_v40 = vpop.f32.mrf.mxu3  ;;  %v350_v42 = vpop.f32.mrf.mxu0  ;;  %v307_v9 = vmax.f32 %v279_v5, %v301_v39 }
  0xb2   : > { %v378_v43 = vpop.f32.mrf.mxu1  ;;  %v360_v45 = vmax.f32 %v332_v41, %v350_v42 }
  0xb3   : > { %v335_v15 = vmax.f32 %v307_v9, %v329_v40 }
  0xb4   : > { %v388_v47 = vmax.f32 %v360_v45, %v378_v43 }
  0xb8   : > { %v406_v49 = vpop.f32.mrf.mxu2 }
  0xb9   : > { %v434_v50 = vpop.f32.mrf.mxu3  ;;  %v416_v52 = vmax.f32 %v388_v47, %v406_v49  ;;  %v352_v53 = vpop.f32.mrf.mxu0 }
  0xba   : > { %v380_v54 = vpop.f32.mrf.mxu1  ;;  %v361_v57 = vmax.f32 %v333_v51, %v352_v53 }
  0xbb   : > { %v444_v56 = vmax.f32 %v416_v52, %v434_v50 }
  0xbc   : > { %v389_v60 = vmax.f32 %v361_v57, %v380_v54 }
  0xbd   : > { %v468_v59 = vadd.f32 %v451_v48, %v444_v56 }
  0xbf   : > { %v472_v61 = vmax.f32 %v468_v59, 0.0 }
  0xc0   : > { %v408_v62 = vpop.f32.mrf.mxu2 }
  0xc1   : > { %v436_v63 = vpop.f32.mrf.mxu3  ;;  %v476_v1 = vpack.c.bf16 %v472_v61, %v472_v61  ;;  %v417_v2 = vmax.f32 %v389_v60, %v408_v62  ;;  %v355_v3 = vpop.f32.mrf.mxu0 }
  0xc2   : > { %v362_v7 = vmax.f32 %v334_v0, %v355_v3  ;;  %v383_v8 = vpop.f32.mrf.mxu1 }
  0xc3   : > { %481 = vst.msk [vmem:[%s759_s7] sm:$0xf] %vm480_vm2, %v476_v1  ;;  %v445_v6 = vmax.f32 %v417_v2, %v436_v63 }
  0xc4   : > { %v390_v11 = vmax.f32 %v362_v7, %v383_v8 }
  0xc5   : > { %v469_v10 = vadd.f32 %v456_v4, %v445_v6 }
  0xc7   : > { %v473_v12 = vmax.f32 %v469_v10, 0.0 }
  0xc8   : > { %v411_v13 = vpop.f32.mrf.mxu2 }
  0xc9   : > { %v439_v14 = vpop.f32.mrf.mxu3  ;;  %v477_v16 = vpack.c.bf16 %v473_v12, %v473_v12  ;;  %v418_v17 = vmax.f32 %v390_v11, %v411_v13  ;;  %v357_v18 = vpop.f32.mrf.mxu0 }
  0xca   : > { %v363_v21 = vmax.f32 %v335_v15, %v357_v18  ;;  %v385_v23 = vpop.f32.mrf.mxu1 }
  0xcb   : > { %482 = vst.msk [vmem:[%s759_s7 + $0x4] sm:$0xf] %vm480_vm2, %v477_v16  ;;  %v446_v20 = vmax.f32 %v418_v17, %v439_v14 }
  0xcc   : > { %v391_v25 = vmax.f32 %v363_v21, %v385_v23 }
  0xcd   : > { %v470_v22 = vadd.f32 %v461_v19, %v446_v20 }
  0xcf   : > { %v474_v24 = vmax.f32 %v470_v22, 0.0 }
  0xd0   : > { %v413_v26 = vpop.f32.mrf.mxu2 }
  0xd1   : > { %v478_v27 = vpack.c.bf16 %v474_v24, %v474_v24  ;;  %v419_v28 = vmax.f32 %v391_v25, %v413_v26  ;;  %v441_v29 = vpop.f32.mrf.mxu3 }
  0xd3   : > { %483 = vst.msk [vmem:[%s759_s7 + $0x8] sm:$0xf] %vm480_vm2, %v478_v27  ;;  %v447_v30 = vmax.f32 %v419_v28, %v441_v29 }
  0xd5   : > { %v471_v32 = vadd.f32 %v466_v31, %v447_v30 }
  0xd7   : > { %v475_v33 = vmax.f32 %v471_v32, 0.0 }
  0xd9   : > { %v479_v34 = vpack.c.bf16 %v475_v33, %v475_v33 }
  0xdb   : > { %484 = vst.msk [vmem:[%s759_s7 + $0xc] sm:$0xf] %vm480_vm2, %v479_v34 }
  0xdc PF: > { %s13_s14 = sadd.s32 1, %s663_s14   ;;  %s782_s12 = smov %s659_s13 }
  0xdd   : > { %p10_p5 = scmp.ge.s32.totalorder %s13_s14, 4   ;;  %s783_s13 = smov %s785_s15 }
  0xdf   :  { %12 = sbr.rel (!%p10_p5) target bundleno = 2 (0x2), region = 69 }

</bundles_post_ra>
